<compile_context>
chip_gen: v6e
topology: v6e:2x2x1
jax: 0.10.0
libtpu: 0.0.40
codegen_flags: <defaults>
</compile_context>

<pallas_src>
import math
from functools import partial

import jax
import jax.numpy as jnp
from jax import lax
from jax.experimental import pallas as pl
from jax.experimental.pallas import tpu as pltpu


def _fused_conv1d_relu_kernel(x_ref, w_ref, b_ref, o_ref, xpad_ref, *,
                              B, L, L_out, K_span, pad_max):
    """Fused multi-filter Conv1d + bias + ReLU.

    x_ref:    (B, L, Cin)             unpadded input; time on sublanes, channels on lanes
    w_ref:    (K_span, Cin, Cout_pad) stacked weights, one (Cin, Cout_pad) matrix per tap
    b_ref:    (1, Cout_pad)           stacked bias (zero in the padded lanes)
    o_ref:    (B, L_out, Cout_pad)    ReLU(conv) output, lane-dense (Cout_pad % 128 == 0)
    xpad_ref: (B, L_pad, Cin)         VMEM scratch holding the zero-padded input slab
    """
    # Build the zero-padded slab in VMEM (replaces the old HBM jnp.pad round trip).
    xpad_ref[...] = jnp.zeros_like(xpad_ref)
    for bi in range(B):                                  # B is small & static -> unrolled
        xpad_ref[bi, pad_max:pad_max + L, :] = x_ref[bi]

    bias = b_ref[...]                                    # (1, Cout_pad), broadcasts over rows
    for bi in range(B):
        acc = jnp.zeros((L_out, o_ref.shape[-1]), jnp.float32)
        for k in range(K_span):                          # static -> fully unrolled, all taps hit the MXU
            acc = acc + jnp.dot(
                xpad_ref[bi, k:k + L_out, :],            # (L_out, Cin) sublane-shifted read
                w_ref[k],                                # (Cin, Cout_pad)
                preferred_element_type=jnp.float32,
            )
        acc = acc + bias
        # One wide, unmasked 128-lane store per batch row block.
        o_ref[bi] = jnp.maximum(acc, 0.0).astype(o_ref.dtype)


def conv1d_moving_average(x_ncl, params):
    """Forward pass of Conv1dMovingAverage: per-filter Conv1d + ReLU, concat on channels.

    x_ncl:  (B, Cin, L) float32
    params: list of (w, b), w: (Cout_i, Cin, K_i), b: (Cout_i,)
    returns (B, sum(Cout_i), L_out) -- identical to torch.cat([relu(conv_i(x))], dim=1)
    """
    B, Cin, L = x_ncl.shape
    k_list = [int(w.shape[-1]) for w, _ in params]
    cout_list = [int(w.shape[0]) for w, _ in params]
    pad_list = [k // 2 for k in k_list]
    lout_list = [L + 2 * p - k + 1 for p, k in zip(pad_list, k_list)]
    assert len(set(lout_list)) == 1, "all filters must produce equal lengths to concat"
    L_out = lout_list[0]

    # Align every filter's taps inside one common padded window of half-width pad_max.
    pad_max = max(pad_list)
    offsets = [pad_max - p for p in pad_list]
    K_span = max(o + k for o, k in zip(offsets, k_list))
    L_pad = L_out + K_span - 1
    assert L_pad >= pad_max + L  # the real samples fit inside the padded slab

    cout_total = sum(cout_list)
    cout_pad = ((cout_total + 127) // 128) * 128        # lane-dense output width

    # Stack all filters' weights/biases into a single tensor (tiny; zero taps/lanes elsewhere).
    w_stk = jnp.zeros((K_span, Cin, cout_pad), jnp.float32)
    b_stk = jnp.zeros((1, cout_pad), jnp.float32)
    co = 0
    for (w, b), off, k, cout in zip(params, offsets, k_list, cout_list):
        w_kic = jnp.transpose(w, (2, 1, 0)).astype(jnp.float32)     # (K_i, Cin, Cout_i)
        w_stk = w_stk.at[off:off + k, :, co:co + cout].set(w_kic)
        b_stk = b_stk.at[0, co:co + cout].set(b.astype(jnp.float32))
        co += cout

    x_lc = jnp.transpose(x_ncl, (0, 2, 1))              # (B, L, Cin) -- the single input transpose

    out = pl.pallas_call(
        partial(_fused_conv1d_relu_kernel,
                B=B, L=L, L_out=L_out, K_span=K_span, pad_max=pad_max),
        out_shape=jax.ShapeDtypeStruct((B, L_out, cout_pad), x_ncl.dtype),
        grid=(1,),                                       # single launch, single grid step
        in_specs=[
            pl.BlockSpec((B, L, Cin), lambda i: (0, 0, 0)),
            pl.BlockSpec((K_span, Cin, cout_pad), lambda i: (0, 0, 0)),
            pl.BlockSpec((1, cout_pad), lambda i: (0, 0)),
        ],
        out_specs=pl.BlockSpec((B, L_out, cout_pad), lambda i: (0, 0, 0)),
        scratch_shapes=[pltpu.VMEM((B, L_pad, Cin), jnp.float32)],
        compiler_params=pltpu.CompilerParams(dimension_semantics=("arbitrary",)),
    )(x_lc, w_stk, b_stk)

    # Drop the zero pad lanes and return to NCL in one op (equivalent to torch.cat(dim=1)).
    return jnp.transpose(out[:, :, :cout_total], (0, 2, 1))


def _reference(x_ncl, params):
    """Pure-JAX reference (lax conv) for correctness check."""
    outs = []
    for w, b in params:
        K = w.shape[-1]
        pad = K // 2
        y = lax.conv_general_dilated(
            x_ncl, w, window_strides=(1,), padding=[(pad, pad)],
            dimension_numbers=("NCH", "OIH", "NCH"),
        )
        y = y + b[None, :, None]
        outs.append(jnp.maximum(y, 0.0))
    return jnp.concatenate(outs, axis=1)


if __name__ == "__main__":
    B, Cin, L = 2, 4, 16
    # filters = [(num_channels, num_kernel), ...]  (odd kernels -> exact 'same' length)
    filters = [(8, 3), (6, 5)]

    key = jax.random.PRNGKey(0)
    kx, *pkeys = jax.random.split(key, 1 + 2 * len(filters))
    x = jax.random.normal(kx, (B, Cin, L), dtype=jnp.float32)

    # Deterministic parameter init (shapes match nn.Conv1d; uniform(-1/sqrt(fan_in), ..)).
    params = []
    for i, (cout, k) in enumerate(filters):
        bound = 1.0 / math.sqrt(Cin * k)
        w = jax.random.uniform(pkeys[2 * i], (cout, Cin, k), jnp.float32, -bound, bound)
        b = jax.random.uniform(pkeys[2 * i + 1], (cout,), jnp.float32, -bound, bound)
        params.append((w, b))

    out = conv1d_moving_average(x, params)
    out = jax.block_until_ready(out)

    ref = _reference(x, params)
    assert out.shape == (B, sum(c for c, _ in filters), L), out.shape
    assert jnp.allclose(out, ref, atol=1e-5, rtol=1e-5), "mismatch vs reference"

    print("KERNEL_OK")
</pallas_src>

<mosaic_0001>
module attributes {stable_mosaic.version = 11 : i64} {
  func.func @_fused_conv1d_relu_kernel(%arg0: i32, %arg1: memref<2x16x4xf32, #tpu.memory_space<vmem>>, %arg2: memref<5x4x128xf32, #tpu.memory_space<vmem>>, %arg3: memref<1x128xf32, #tpu.memory_space<vmem>>, %arg4: memref<2x16x128xf32, #tpu.memory_space<vmem>>, %arg5: memref<2x20x4xf32, #tpu.memory_space<vmem>>) attributes {dimension_semantics = [#tpu.dimension_semantics<arbitrary>], iteration_bounds = array<i64: 1>, scalar_prefetch = 0 : i64, scratch_operands = 1 : i64, tpu.core_type = #tpu.core_type<tc>, window_params = [{pipeline_mode = #tpu.pipeline_mode<synchronous>, transform_indices = @transform_0, window_bounds = array<i64: 2, 16, 4>}, {pipeline_mode = #tpu.pipeline_mode<synchronous>, transform_indices = @transform_1, window_bounds = array<i64: 5, 4, 128>}, {pipeline_mode = #tpu.pipeline_mode<synchronous>, transform_indices = @transform_2, window_bounds = array<i64: 1, 128>}, {pipeline_mode = #tpu.pipeline_mode<synchronous>, transform_indices = @transform_3, window_bounds = array<i64: 2, 16, 128>}]} {
    %cst = arith.constant 0.000000e+00 : f32
    %0 = vector.broadcast %cst : f32 to vector<2x20x4xf32>
    %c0 = arith.constant 0 : index
    %c0_0 = arith.constant 0 : index
    %c0_1 = arith.constant 0 : index
    %1 = vector.load %arg5[%c0, %c0_0, %c0_1] : memref<2x20x4xf32, #tpu.memory_space<vmem>>, vector<2x20x4xf32>
    tpu.vector_store %arg5[%c0, %c0_0, %c0_1], %0 {strides = array<i32>} : memref<2x20x4xf32, #tpu.memory_space<vmem>>, vector<2x20x4xf32>,
    %c0_2 = arith.constant 0 : index
    %c0_3 = arith.constant 0 : index
    %c0_4 = arith.constant 0 : index
    %2 = vector.load %arg1[%c0_2, %c0_3, %c0_4] : memref<2x16x4xf32, #tpu.memory_space<vmem>>, vector<1x16x4xf32>
    %3 = vector.shape_cast %2 : vector<1x16x4xf32> to vector<16x4xf32>
    %c0_5 = arith.constant 0 : index
    %c2 = arith.constant 2 : index
    %c0_6 = arith.constant 0 : index
    %4 = vector.load %arg5[%c0_5, %c2, %c0_6] : memref<2x20x4xf32, #tpu.memory_space<vmem>>, vector<1x16x4xf32>
    %5 = vector.shape_cast %4 : vector<1x16x4xf32> to vector<16x4xf32>
    %6 = vector.shape_cast %3 : vector<16x4xf32> to vector<1x16x4xf32>
    tpu.vector_store %arg5[%c0_5, %c2, %c0_6], %6 {strides = array<i32>} : memref<2x20x4xf32, #tpu.memory_space<vmem>>, vector<1x16x4xf32>,
    %c1 = arith.constant 1 : index
    %c0_7 = arith.constant 0 : index
    %c0_8 = arith.constant 0 : index
    %7 = vector.load %arg1[%c1, %c0_7, %c0_8] : memref<2x16x4xf32, #tpu.memory_space<vmem>>, vector<1x16x4xf32>
    %8 = vector.shape_cast %7 : vector<1x16x4xf32> to vector<16x4xf32>
    %c1_9 = arith.constant 1 : index
    %c2_10 = arith.constant 2 : index
    %c0_11 = arith.constant 0 : index
    %9 = vector.load %arg5[%c1_9, %c2_10, %c0_11] : memref<2x20x4xf32, #tpu.memory_space<vmem>>, vector<1x16x4xf32>
    %10 = vector.shape_cast %9 : vector<1x16x4xf32> to vector<16x4xf32>
    %11 = vector.shape_cast %8 : vector<16x4xf32> to vector<1x16x4xf32>
    tpu.vector_store %arg5[%c1_9, %c2_10, %c0_11], %11 {strides = array<i32>} : memref<2x20x4xf32, #tpu.memory_space<vmem>>, vector<1x16x4xf32>,
    %c0_12 = arith.constant 0 : index
    %c0_13 = arith.constant 0 : index
    %12 = vector.load %arg3[%c0_12, %c0_13] : memref<1x128xf32, #tpu.memory_space<vmem>>, vector<1x128xf32>
    %cst_14 = arith.constant 0.000000e+00 : f32
    %13 = vector.broadcast %cst_14 : f32 to vector<16x128xf32>
    %c0_15 = arith.constant 0 : index
    %c0_16 = arith.constant 0 : index
    %c0_17 = arith.constant 0 : index
    %14 = vector.load %arg5[%c0_15, %c0_16, %c0_17] : memref<2x20x4xf32, #tpu.memory_space<vmem>>, vector<1x16x4xf32>
    %15 = vector.shape_cast %14 : vector<1x16x4xf32> to vector<16x4xf32>
    %c0_18 = arith.constant 0 : index
    %c0_19 = arith.constant 0 : index
    %c0_20 = arith.constant 0 : index
    %16 = vector.load %arg2[%c0_18, %c0_19, %c0_20] : memref<5x4x128xf32, #tpu.memory_space<vmem>>, vector<1x4x128xf32>
    %17 = vector.shape_cast %16 : vector<1x4x128xf32> to vector<4x128xf32>
    %cst_21 = arith.constant dense<0.000000e+00> : vector<16x128xf32>
    %18 = tpu.matmul %15, %17, %cst_21 {dimension_numbers = #tpu.dot_dimension_numbers<[1], [0], [0], [1], [0, 0, 1, 1], [], []>} : vector<16x4xf32>, vector<4x128xf32>, vector<16x128xf32> -> vector<16x128xf32>
    %19 = arith.addf %13, %18 : vector<16x128xf32>
    %c0_22 = arith.constant 0 : index
    %c1_23 = arith.constant 1 : index
    %c0_24 = arith.constant 0 : index
    %20 = vector.load %arg5[%c0_22, %c1_23, %c0_24] : memref<2x20x4xf32, #tpu.memory_space<vmem>>, vector<1x16x4xf32>
    %21 = vector.shape_cast %20 : vector<1x16x4xf32> to vector<16x4xf32>
    %c1_25 = arith.constant 1 : index
    %c0_26 = arith.constant 0 : index
    %c0_27 = arith.constant 0 : index
    %22 = vector.load %arg2[%c1_25, %c0_26, %c0_27] : memref<5x4x128xf32, #tpu.memory_space<vmem>>, vector<1x4x128xf32>
    %23 = vector.shape_cast %22 : vector<1x4x128xf32> to vector<4x128xf32>
    %cst_28 = arith.constant dense<0.000000e+00> : vector<16x128xf32>
    %24 = tpu.matmul %21, %23, %cst_28 {dimension_numbers = #tpu.dot_dimension_numbers<[1], [0], [0], [1], [0, 0, 1, 1], [], []>} : vector<16x4xf32>, vector<4x128xf32>, vector<16x128xf32> -> vector<16x128xf32>
    %25 = arith.addf %19, %24 : vector<16x128xf32>
    %c0_29 = arith.constant 0 : index
    %c2_30 = arith.constant 2 : index
    %c0_31 = arith.constant 0 : index
    %26 = vector.load %arg5[%c0_29, %c2_30, %c0_31] : memref<2x20x4xf32, #tpu.memory_space<vmem>>, vector<1x16x4xf32>
    %27 = vector.shape_cast %26 : vector<1x16x4xf32> to vector<16x4xf32>
    %c2_32 = arith.constant 2 : index
    %c0_33 = arith.constant 0 : index
    %c0_34 = arith.constant 0 : index
    %28 = vector.load %arg2[%c2_32, %c0_33, %c0_34] : memref<5x4x128xf32, #tpu.memory_space<vmem>>, vector<1x4x128xf32>
    %29 = vector.shape_cast %28 : vector<1x4x128xf32> to vector<4x128xf32>
    %cst_35 = arith.constant dense<0.000000e+00> : vector<16x128xf32>
    %30 = tpu.matmul %27, %29, %cst_35 {dimension_numbers = #tpu.dot_dimension_numbers<[1], [0], [0], [1], [0, 0, 1, 1], [], []>} : vector<16x4xf32>, vector<4x128xf32>, vector<16x128xf32> -> vector<16x128xf32>
    %31 = arith.addf %25, %30 : vector<16x128xf32>
    %c0_36 = arith.constant 0 : index
    %c3 = arith.constant 3 : index
    %c0_37 = arith.constant 0 : index
    %32 = vector.load %arg5[%c0_36, %c3, %c0_37] : memref<2x20x4xf32, #tpu.memory_space<vmem>>, vector<1x16x4xf32>
    %33 = vector.shape_cast %32 : vector<1x16x4xf32> to vector<16x4xf32>
    %c3_38 = arith.constant 3 : index
    %c0_39 = arith.constant 0 : index
    %c0_40 = arith.constant 0 : index
    %34 = vector.load %arg2[%c3_38, %c0_39, %c0_40] : memref<5x4x128xf32, #tpu.memory_space<vmem>>, vector<1x4x128xf32>
    %35 = vector.shape_cast %34 : vector<1x4x128xf32> to vector<4x128xf32>
    %cst_41 = arith.constant dense<0.000000e+00> : vector<16x128xf32>
    %36 = tpu.matmul %33, %35, %cst_41 {dimension_numbers = #tpu.dot_dimension_numbers<[1], [0], [0], [1], [0, 0, 1, 1], [], []>} : vector<16x4xf32>, vector<4x128xf32>, vector<16x128xf32> -> vector<16x128xf32>
    %37 = arith.addf %31, %36 : vector<16x128xf32>
    %c0_42 = arith.constant 0 : index
    %c4 = arith.constant 4 : index
    %c0_43 = arith.constant 0 : index
    %38 = vector.load %arg5[%c0_42, %c4, %c0_43] : memref<2x20x4xf32, #tpu.memory_space<vmem>>, vector<1x16x4xf32>
    %39 = vector.shape_cast %38 : vector<1x16x4xf32> to vector<16x4xf32>
    %c4_44 = arith.constant 4 : index
    %c0_45 = arith.constant 0 : index
    %c0_46 = arith.constant 0 : index
    %40 = vector.load %arg2[%c4_44, %c0_45, %c0_46] : memref<5x4x128xf32, #tpu.memory_space<vmem>>, vector<1x4x128xf32>
    %41 = vector.shape_cast %40 : vector<1x4x128xf32> to vector<4x128xf32>
    %cst_47 = arith.constant dense<0.000000e+00> : vector<16x128xf32>
    %42 = tpu.matmul %39, %41, %cst_47 {dimension_numbers = #tpu.dot_dimension_numbers<[1], [0], [0], [1], [0, 0, 1, 1], [], []>} : vector<16x4xf32>, vector<4x128xf32>, vector<16x128xf32> -> vector<16x128xf32>
    %43 = arith.addf %37, %42 : vector<16x128xf32>
    %44 = vector.broadcast %12 : vector<1x128xf32> to vector<16x128xf32>
    %45 = arith.addf %43, %44 : vector<16x128xf32>
    %cst_48 = arith.constant 0.000000e+00 : f32
    %46 = vector.broadcast %cst_48 : f32 to vector<16x128xf32>
    %47 = arith.maximumf %45, %46 : vector<16x128xf32>
    %c0_49 = arith.constant 0 : index
    %c0_50 = arith.constant 0 : index
    %c0_51 = arith.constant 0 : index
    %48 = vector.load %arg4[%c0_49, %c0_50, %c0_51] : memref<2x16x128xf32, #tpu.memory_space<vmem>>, vector<1x16x128xf32>
    %49 = vector.shape_cast %48 : vector<1x16x128xf32> to vector<16x128xf32>
    %50 = vector.shape_cast %47 : vector<16x128xf32> to vector<1x16x128xf32>
    tpu.vector_store %arg4[%c0_49, %c0_50, %c0_51], %50 {strides = array<i32>} : memref<2x16x128xf32, #tpu.memory_space<vmem>>, vector<1x16x128xf32>,
    %cst_52 = arith.constant 0.000000e+00 : f32
    %51 = vector.broadcast %cst_52 : f32 to vector<16x128xf32>
    %c1_53 = arith.constant 1 : index
    %c0_54 = arith.constant 0 : index
    %c0_55 = arith.constant 0 : index
    %52 = vector.load %arg5[%c1_53, %c0_54, %c0_55] : memref<2x20x4xf32, #tpu.memory_space<vmem>>, vector<1x16x4xf32>
    %53 = vector.shape_cast %52 : vector<1x16x4xf32> to vector<16x4xf32>
    %c0_56 = arith.constant 0 : index
    %c0_57 = arith.constant 0 : index
    %c0_58 = arith.constant 0 : index
    %54 = vector.load %arg2[%c0_56, %c0_57, %c0_58] : memref<5x4x128xf32, #tpu.memory_space<vmem>>, vector<1x4x128xf32>
    %55 = vector.shape_cast %54 : vector<1x4x128xf32> to vector<4x128xf32>
    %cst_59 = arith.constant dense<0.000000e+00> : vector<16x128xf32>
    %56 = tpu.matmul %53, %55, %cst_59 {dimension_numbers = #tpu.dot_dimension_numbers<[1], [0], [0], [1], [0, 0, 1, 1], [], []>} : vector<16x4xf32>, vector<4x128xf32>, vector<16x128xf32> -> vector<16x128xf32>
    %57 = arith.addf %51, %56 : vector<16x128xf32>
    %c1_60 = arith.constant 1 : index
    %c1_61 = arith.constant 1 : index
    %c0_62 = arith.constant 0 : index
    %58 = vector.load %arg5[%c1_60, %c1_61, %c0_62] : memref<2x20x4xf32, #tpu.memory_space<vmem>>, vector<1x16x4xf32>
    %59 = vector.shape_cast %58 : vector<1x16x4xf32> to vector<16x4xf32>
    %c1_63 = arith.constant 1 : index
    %c0_64 = arith.constant 0 : index
    %c0_65 = arith.constant 0 : index
    %60 = vector.load %arg2[%c1_63, %c0_64, %c0_65] : memref<5x4x128xf32, #tpu.memory_space<vmem>>, vector<1x4x128xf32>
    %61 = vector.shape_cast %60 : vector<1x4x128xf32> to vector<4x128xf32>
    %cst_66 = arith.constant dense<0.000000e+00> : vector<16x128xf32>
    %62 = tpu.matmul %59, %61, %cst_66 {dimension_numbers = #tpu.dot_dimension_numbers<[1], [0], [0], [1], [0, 0, 1, 1], [], []>} : vector<16x4xf32>, vector<4x128xf32>, vector<16x128xf32> -> vector<16x128xf32>
    %63 = arith.addf %57, %62 : vector<16x128xf32>
    %c1_67 = arith.constant 1 : index
    %c2_68 = arith.constant 2 : index
    %c0_69 = arith.constant 0 : index
    %64 = vector.load %arg5[%c1_67, %c2_68, %c0_69] : memref<2x20x4xf32, #tpu.memory_space<vmem>>, vector<1x16x4xf32>
    %65 = vector.shape_cast %64 : vector<1x16x4xf32> to vector<16x4xf32>
    %c2_70 = arith.constant 2 : index
    %c0_71 = arith.constant 0 : index
    %c0_72 = arith.constant 0 : index
    %66 = vector.load %arg2[%c2_70, %c0_71, %c0_72] : memref<5x4x128xf32, #tpu.memory_space<vmem>>, vector<1x4x128xf32>
    %67 = vector.shape_cast %66 : vector<1x4x128xf32> to vector<4x128xf32>
    %cst_73 = arith.constant dense<0.000000e+00> : vector<16x128xf32>
    %68 = tpu.matmul %65, %67, %cst_73 {dimension_numbers = #tpu.dot_dimension_numbers<[1], [0], [0], [1], [0, 0, 1, 1], [], []>} : vector<16x4xf32>, vector<4x128xf32>, vector<16x128xf32> -> vector<16x128xf32>
    %69 = arith.addf %63, %68 : vector<16x128xf32>
    %c1_74 = arith.constant 1 : index
    %c3_75 = arith.constant 3 : index
    %c0_76 = arith.constant 0 : index
    %70 = vector.load %arg5[%c1_74, %c3_75, %c0_76] : memref<2x20x4xf32, #tpu.memory_space<vmem>>, vector<1x16x4xf32>
    %71 = vector.shape_cast %70 : vector<1x16x4xf32> to vector<16x4xf32>
    %c3_77 = arith.constant 3 : index
    %c0_78 = arith.constant 0 : index
    %c0_79 = arith.constant 0 : index
    %72 = vector.load %arg2[%c3_77, %c0_78, %c0_79] : memref<5x4x128xf32, #tpu.memory_space<vmem>>, vector<1x4x128xf32>
    %73 = vector.shape_cast %72 : vector<1x4x128xf32> to vector<4x128xf32>
    %cst_80 = arith.constant dense<0.000000e+00> : vector<16x128xf32>
    %74 = tpu.matmul %71, %73, %cst_80 {dimension_numbers = #tpu.dot_dimension_numbers<[1], [0], [0], [1], [0, 0, 1, 1], [], []>} : vector<16x4xf32>, vector<4x128xf32>, vector<16x128xf32> -> vector<16x128xf32>
    %75 = arith.addf %69, %74 : vector<16x128xf32>
    %c1_81 = arith.constant 1 : index
    %c4_82 = arith.constant 4 : index
    %c0_83 = arith.constant 0 : index
    %76 = vector.load %arg5[%c1_81, %c4_82, %c0_83] : memref<2x20x4xf32, #tpu.memory_space<vmem>>, vector<1x16x4xf32>
    %77 = vector.shape_cast %76 : vector<1x16x4xf32> to vector<16x4xf32>
    %c4_84 = arith.constant 4 : index
    %c0_85 = arith.constant 0 : index
    %c0_86 = arith.constant 0 : index
    %78 = vector.load %arg2[%c4_84, %c0_85, %c0_86] : memref<5x4x128xf32, #tpu.memory_space<vmem>>, vector<1x4x128xf32>
    %79 = vector.shape_cast %78 : vector<1x4x128xf32> to vector<4x128xf32>
    %cst_87 = arith.constant dense<0.000000e+00> : vector<16x128xf32>
    %80 = tpu.matmul %77, %79, %cst_87 {dimension_numbers = #tpu.dot_dimension_numbers<[1], [0], [0], [1], [0, 0, 1, 1], [], []>} : vector<16x4xf32>, vector<4x128xf32>, vector<16x128xf32> -> vector<16x128xf32>
    %81 = arith.addf %75, %80 : vector<16x128xf32>
    %82 = vector.broadcast %12 : vector<1x128xf32> to vector<16x128xf32>
    %83 = arith.addf %81, %82 : vector<16x128xf32>
    %cst_88 = arith.constant 0.000000e+00 : f32
    %84 = vector.broadcast %cst_88 : f32 to vector<16x128xf32>
    %85 = arith.maximumf %83, %84 : vector<16x128xf32>
    %c1_89 = arith.constant 1 : index
    %c0_90 = arith.constant 0 : index
    %c0_91 = arith.constant 0 : index
    %86 = vector.load %arg4[%c1_89, %c0_90, %c0_91] : memref<2x16x128xf32, #tpu.memory_space<vmem>>, vector<1x16x128xf32>
    %87 = vector.shape_cast %86 : vector<1x16x128xf32> to vector<16x128xf32>
    %88 = vector.shape_cast %85 : vector<16x128xf32> to vector<1x16x128xf32>
    tpu.vector_store %arg4[%c1_89, %c0_90, %c0_91], %88 {strides = array<i32>} : memref<2x16x128xf32, #tpu.memory_space<vmem>>, vector<1x16x128xf32>,
    return
  }
  func.func @transform_0(%arg0: i32) -> (i32, i32, i32) {
    %c0_i32 = arith.constant 0 : i32
    %c0_i32_0 = arith.constant 0 : i32
    %c0_i32_1 = arith.constant 0 : i32
    %c0_i32_2 = arith.constant 0 : i32
    return %c0_i32, %c0_i32_0, %c0_i32_1 : i32, i32, i32
  }
  func.func @transform_1(%arg0: i32) -> (i32, i32, i32) {
    %c0_i32 = arith.constant 0 : i32
    %c0_i32_0 = arith.constant 0 : i32
    %c0_i32_1 = arith.constant 0 : i32
    %c0_i32_2 = arith.constant 0 : i32
    return %c0_i32, %c0_i32_0, %c0_i32_1 : i32, i32, i32
  }
  func.func @transform_2(%arg0: i32) -> (i32, i32) {
    %c0_i32 = arith.constant 0 : i32
    %c0_i32_0 = arith.constant 0 : i32
    %c0_i32_1 = arith.constant 0 : i32
    return %c0_i32, %c0_i32_0 : i32, i32
  }
  func.func @transform_3(%arg0: i32) -> (i32, i32, i32) {
    %c0_i32 = arith.constant 0 : i32
    %c0_i32_0 = arith.constant 0 : i32
    %c0_i32_1 = arith.constant 0 : i32
    %c0_i32_2 = arith.constant 0 : i32
    return %c0_i32, %c0_i32_0, %c0_i32_1 : i32, i32, i32
  }
}

</mosaic_0001>

<bundles_post_ra>
// kernel: tpu_custom_call.1
= control target key start
LH: loop header
LB: loop body
LE: loop exit
PB: predicated region body
PF: predicated region fallthrough
CT: control target
= control target key end

     0   :  { %vm47_vm0 = vcmask 1043456   ;;  %vm15_vm1 = vcmask 31744   ;;  %vm18_vm2 = vcmask 27648   ;;  %v1103_v5 = vmov 0.0   ;;  %s1223_s0 = inlined_call_operand.vmem [shape: f32[2,16,4], index: 0, kind: input, shape index: {}]   ;;  %s1224_s1 = inlined_call_operand.vmem [shape: f32[5,4,128], index: 1, kind: input, shape index: {}]   ;;  %s1225_s2 = inlined_call_operand.vmem [shape: f32[1,128], index: 2, kind: input, shape index: {}]   ;;  %s1226_s3 = inlined_call_operand.hbm [shape: f32[2,16,128], index: 3, kind: output, shape index: {}]  }
   0x1   :  { %v958_v0 = vld [vmem:[%s1224_s1 + $0x4] sm:$0xf]  ;;  %v36_v1 = vld [vmem:[%s1224_s1] sm:$0xf]  ;;  %v965_v3 = vld [vmem:[%s1224_s1 + $0x8] sm:$0xf] }
   0x2   :  { %1027 = vmatprep.subr.msk.mxu0 %vm47_vm0, %v958_v0  ;;  %1032 = vmatprep.subr.msk.mxu1 %vm47_vm0, %v36_v1  ;;  %v23_v2 = vld [vmem:[%s1223_s0] sm:$0xff]  ;;  %v24_v4 = vld [vmem:[%s1223_s0 + $0x8] sm:$0xff]  ;;  %16 = vst.msk [vmem:[#allocation2] sm:$0xff] %vm15_vm1, %v1103_v5  ;;  %17 = vst.msk [vmem:[#allocation2 + $0x8] sm:$0xff] %vm15_vm1, %v1103_v5 }
   0x3   :  { %1028 = vmatpush3.msk.msra.mxu0 %vm47_vm0, %v958_v0  ;;  %20 = vst.msk [vmem:[#allocation2 + $0x18] sm:$0xff] %vm15_vm1, %v1103_v5  ;;  %21 = vst.msk [vmem:[#allocation2 + $0x20] sm:$0xff] %vm15_vm1, %v1103_v5  ;;  %1033 = vmatpush3.msk.msra.mxu1 %vm47_vm0, %v36_v1  ;;  %v969_v6 = vld [vmem:[%s1224_s1 + $0xc] sm:$0xf]  ;;  %v956_v7 = vld [vmem:[%s1223_s0 + $0x10] sm:$0xff] }
   0x4   :  { %19 = vst.msk [vmem:[#allocation2 + $0x10] sm:$0xf] %vm18_vm2, %v1103_v5  ;;  %22 = vst.msk [vmem:[#allocation2 + $0x28] sm:$0xf] %vm18_vm2, %v1103_v5  ;;  %1037 = vmatprep.subr.msk.mxu0 %vm47_vm0, %v965_v3  ;;  %1042 = vmatprep.subr.msk.mxu1 %vm47_vm0, %v969_v6  ;;  %v957_v8 = vld [vmem:[%s1223_s0 + $0x18] sm:$0xff] }
   0x5   :  { %25 = vst.msk [vmem:[#allocation2 + $0x2] sm:$0xff] %vm15_vm1, %v23_v2  ;;  %26 = vst.msk [vmem:[#allocation2 + $0xa] sm:$0xff] %vm15_vm1, %v24_v4 }
   0x6   :  { %31 = vst.msk [vmem:[#allocation2 + $0x1a] sm:$0xff] %vm15_vm1, %v956_v7  ;;  %32 = vst.msk [vmem:[#allocation2 + $0x22] sm:$0xff] %vm15_vm1, %v957_v8 }
   0x7   :  { %8 = vsyncpa [#allocation4], 0  ;;  %v973_v15 = vld [vmem:[%s1224_s1 + $0x10] sm:$0xf]  ;;  %v978_v16 = vld [vmem:[%s1224_s1 + $0x4] sm:$0xf] }
   0x8   :  { %v494_v21 = vld [vmem:[%s1224_s1] sm:$0xf]  ;;  %v985_v22 = vld [vmem:[%s1224_s1 + $0x8] sm:$0xf]  ;;  %v989_v27 = vld [vmem:[%s1224_s1 + $0xc] sm:$0xf] }
   0x9   :  { %v993_v28 = vld [vmem:[%s1224_s1 + $0x10] sm:$0xf]  ;;  %v977_v48 = vld [vmem:[%s1225_s2] ss:$0 sm:$0xff]  ;;  %s1104_s2 = smov [#allocation3]  }
   0xa   :  { %s945_s13 = sshll.u32 %s1104_s2, 4  ;;  %s946_s13 = int_to_ptr.vmem [resolvable:$true] %s945_s13 }
   0xb   :  { %s1081_s14 = scalar_lea.vmem %s946_s13, 512  ;;  %p1086_p1 = scmp.lt.s32.totalorder %s946_s13, %s946_s13 }
   0xc   :  { %v37_v9 = vld [vmem:[#allocation2 + $0x1] sm:$0xff]  ;;  %v38_v11 = vld [vmem:[#allocation2 + $0x9] sm:$0xff]  ;;  %p1082_p0 = scmp.ne.s32.totalorder %s946_s13, %s1081_s14  ;;  %p1087_p2 = scmp.lt.s32.totalorder %s1081_s14, %s1081_s14 }
   0xd   :  { %v34_v10 = vld [vmem:[#allocation2] sm:$0xff]  ;;  %1029 = vmatprep.mubr.msk.f32.mxu0 %vm15_vm1, %v37_v9  ;;  %v35_v12 = vld [vmem:[#allocation2 + $0x8] sm:$0xff]  ;;  %v492_v25 = vld [vmem:[#allocation2 + $0x18] sm:$0xff] }
   0xe   :  { %1034 = vmatprep.mubr.msk.f32.mxu1 %vm15_vm1, %v34_v10  ;;  %v210_v13 = vld [vmem:[#allocation2 + $0x2] sm:$0xff]  ;;  %1030 = vmatmul.mubr.msk.f32.vlgmr.msra.gmra.mxu0 %vm15_vm1, %v38_v11  ;;  %v211_v17 = vld [vmem:[#allocation2 + $0xa] sm:$0xff]  ;;  %v495_v20 = vld [vmem:[#allocation2 + $0x19] sm:$0xff]  ;;  %p1088_p3 = por %p1087_p2, %p1086_p1 }
   0xf   :  { %v300_v14 = vld [vmem:[#allocation2 + $0x3] sm:$0xff]  ;;  %1035 = vmatmul.mubr.msk.f32.vlgmr.msra.gmra.mxu1 %vm15_vm1, %v35_v12  ;;  %1038 = vmatpush3.msk.msra.mxu0 %vm47_vm0, %v965_v3  ;;  %v301_v18 = vld [vmem:[#allocation2 + $0xb] sm:$0xff]  ;;  %v666_v26 = vld [vmem:[#allocation2 + $0x1a] sm:$0xff] }
  0x10   :  { %1043 = vmatpush3.msk.msra.mxu1 %vm47_vm0, %v969_v6  ;;  %1039 = vmatprep.mubr.msk.f32.mxu0 %vm15_vm1, %v210_v13  ;;  %v390_v19 = vld [vmem:[#allocation2 + $0x4] sm:$0xff]  ;;  %v391_v23 = vld [vmem:[#allocation2 + $0xc] sm:$0xff]  ;;  %v755_v31 = vld [vmem:[#allocation2 + $0x1b] sm:$0xff]  ;;  %p1089_p4 = pnand %p1088_p3, %p1082_p0 }
  0x11   :  { %1044 = vmatprep.mubr.msk.f32.mxu1 %vm15_vm1, %v300_v14  ;;  %1047 = vmatprep.subr.msk.mxu0 %vm47_vm0, %v973_v15  ;;  %v496_v24 = vld [vmem:[#allocation2 + $0x21] sm:$0xff] }
  0x12   :  { %1052 = vmatprep.subr.msk.mxu1 %vm47_vm0, %v978_v16  ;;  %1040 = vmatmul.mubr.msk.f32.vlgmr.msra.gmra.mxu0 %vm15_vm1, %v211_v17  ;;  %v493_v29 = vld [vmem:[#allocation2 + $0x20] sm:$0xff] }
  0x13   :  { %1045 = vmatmul.mubr.msk.f32.vlgmr.msra.gmra.mxu1 %vm15_vm1, %v301_v18  ;;  %1048 = vmatpush3.msk.msra.mxu0 %vm47_vm0, %v973_v15  ;;  %v667_v30 = vld [vmem:[#allocation2 + $0x22] sm:$0xff] }
  0x14   :  { %1053 = vmatpush3.msk.msra.mxu1 %vm47_vm0, %v978_v16  ;;  %1049 = vmatprep.mubr.msk.f32.mxu0 %vm15_vm1, %v390_v19  ;;  %v844_v32 = vld [vmem:[#allocation2 + $0x1c] sm:$0xff]  ;;  %v845_v34 = vld [vmem:[#allocation2 + $0x24] sm:$0xff] }
  0x15   :  { %1054 = vmatprep.mubr.msk.f32.mxu1 %vm15_vm1, %v495_v20  ;;  %1057 = vmatprep.subr.msk.mxu0 %vm47_vm0, %v494_v21  ;;  %v756_v33 = vld [vmem:[#allocation2 + $0x23] sm:$0xff] }
  0x16   :  { %1062 = vmatprep.subr.msk.mxu1 %vm47_vm0, %v985_v22  ;;  %1050 = vmatmul.mubr.msk.f32.vlgmr.msra.gmra.mxu0 %vm15_vm1, %v391_v23 }
  0x17   :  { %1055 = vmatmul.mubr.msk.f32.vlgmr.msra.gmra.mxu1 %vm15_vm1, %v496_v24  ;;  %1058 = vmatpush3.msk.msra.mxu0 %vm47_vm0, %v494_v21 }
  0x18   :  { %1063 = vmatpush3.msk.msra.mxu1 %vm47_vm0, %v985_v22  ;;  %1059 = vmatprep.mubr.msk.f32.mxu0 %vm15_vm1, %v492_v25 }
  0x19   :  { %1064 = vmatprep.mubr.msk.f32.mxu1 %vm15_vm1, %v666_v26  ;;  %1067 = vmatprep.subr.msk.mxu0 %vm47_vm0, %v989_v27 }
  0x1a   :  { %1072 = vmatprep.subr.msk.mxu1 %vm47_vm0, %v993_v28  ;;  %1060 = vmatmul.mubr.msk.f32.vlgmr.msra.gmra.mxu0 %vm15_vm1, %v493_v29 }
  0x1b   :  { %1065 = vmatmul.mubr.msk.f32.vlgmr.msra.gmra.mxu1 %vm15_vm1, %v667_v30  ;;  %1068 = vmatpush3.msk.msra.mxu0 %vm47_vm0, %v989_v27 }
  0x1c   :  { %1073 = vmatpush3.msk.msra.mxu1 %vm47_vm0, %v993_v28  ;;  %1069 = vmatprep.mubr.msk.f32.mxu0 %vm15_vm1, %v755_v31 }
  0x1d   :  { %1074 = vmatprep.mubr.msk.f32.mxu1 %vm15_vm1, %v844_v32 }
  0x1e   :  { %1070 = vmatmul.mubr.msk.f32.vlgmr.msra.gmra.mxu0 %vm15_vm1, %v756_v33 }
  0x1f   :  { %1075 = vmatmul.mubr.msk.f32.vlgmr.msra.gmra.mxu1 %vm15_vm1, %v845_v34 }
  0xce   :  { %v1031_v35 = vpop.f32.mrf.mxu0 }
  0xcf   :  { %v1036_v36 = vpop.f32.mrf.mxu1 }
  0xd0   :  { %v117_v37 = vpop.f32.mrf.mxu0  ;;  %v207_v39 = vadd.f32 %v1036_v36, %v1031_v35 }
  0xd1   :  { %v201_v38 = vpop.f32.mrf.mxu1 }
  0xd2   :  { %v1041_v40 = vpop.f32.mrf.mxu0  ;;  %v202_v42 = vadd.f32 %v201_v38, %v117_v37 }
  0xd3   :  { %v1046_v41 = vpop.f32.mrf.mxu1  ;;  %v299_v43 = vadd.f32 %v1041_v40, %v207_v39 }
  0xd4   :  { %v289_v44 = vpop.f32.mrf.mxu0 }
  0xd5   :  { %v379_v45 = vpop.f32.mrf.mxu1  ;;  %v389_v46 = vadd.f32 %v1046_v41, %v299_v43  ;;  %v298_v47 = vadd.f32 %v289_v44, %v202_v42 }
  0xd6   :  { %v1051_v49 = vpop.f32.mrf.mxu0 }
  0xd7   :  { %v1056_v50 = vpop.f32.mrf.mxu1  ;;  %v388_v51 = vadd.f32 %v379_v45, %v298_v47  ;;  %v479_v52 = vadd.f32 %v1051_v49, %v389_v46 }
  0xd8   :  { %v469_v53 = vpop.f32.mrf.mxu0 }
  0xd9   :  { %v573_v54 = vpop.f32.mrf.mxu1  ;;  %v487_v55 = vadd.f32 %v977_v48, %v479_v52  ;;  %v478_v56 = vadd.f32 %v469_v53, %v388_v51 }
  0xda   :  { %v1061_v57 = vpop.f32.mrf.mxu0 }
  0xdb   :  { %v1066_v58 = vpop.f32.mrf.mxu1  ;;  %v489_v59 = vmax.f32 %v487_v55, 0.0  ;;  %v486_v60 = vadd.f32 %v977_v48, %v478_v56  ;;  %v663_v61 = vadd.f32 %v1061_v57, %v1056_v50 }
  0xdc   :  { %v657_v62 = vpop.f32.mrf.mxu0 }
  0xdd   :  { %v744_v63 = vpop.f32.mrf.mxu1  ;;  %491 = vst [vmem:[#allocation3 + $0x8] sm:$0xff] %v489_v59  ;;  %v488_v0 = vmax.f32 %v486_v60, 0.0  ;;  %v754_v1 = vadd.f32 %v1066_v58, %v663_v61  ;;  %v658_v2 = vadd.f32 %v657_v62, %v573_v54 }
  0xde   :  { %v1071_v3 = vpop.f32.mrf.mxu0 }
  0xdf   :  { %v1076_v4 = vpop.f32.mrf.mxu1  ;;  %490 = vst [vmem:[#allocation3] sm:$0xff] %v488_v0  ;;  %v753_v5 = vadd.f32 %v744_v63, %v658_v2  ;;  %v843_v6 = vadd.f32 %v1071_v3, %v754_v1 }
  0xe0   :  { %v833_v7 = vpop.f32.mrf.mxu0 }
  0xe1   :  { %v932_v8 = vadd.f32 %v1076_v4, %v843_v6  ;;  %v842_v9 = vadd.f32 %v833_v7, %v753_v5  ;;  %v922_v10 = vpop.f32.mrf.mxu1 }
  0xe3   :  { %v934_v11 = vadd.f32 %v977_v48, %v932_v8  ;;  %v931_v12 = vadd.f32 %v922_v10, %v842_v9 }
  0xe5   :  { %v936_v13 = vmax.f32 %v934_v11, 0.0  ;;  %v933_v14 = vadd.f32 %v977_v48, %v931_v12 }
  0xe7   :  { %939 = vst [vmem:[#allocation3 + $0x18] sm:$0xff] %v936_v13  ;;  %v935_v15 = vmax.f32 %v933_v14, 0.0 }
  0xe9   :  { %938 = vst [vmem:[#allocation3 + $0x10] sm:$0xff] %v935_v15 }
  0xea   :  { %1092 = shalt.err (!%p1089_p4)
}
  0xeb   :  { %s1105_s15 = smov 128   ;;  %s1106_s16 = smov 8  }
  0xec   :  { %951 = dma.vmem_to_hbm [thread:$0]  %s946_s13, 512, %s1226_s3, [#allocation4], %s1105_s15, %s1105_s15, %s1106_s16  }
  0xed   :  { %1101 = dma.done.wait [#allocation4], 512  }
  0xee   :  { %1102 = vsyncadd [#allocation4], 4294966784 }
  0xef   :  { %955 = vsyncpa [#allocation4], 1 }

</bundles_post_ra>
